<compile_context>
chip_gen: v5e
topology: v5e:2x2
jax: 0.10.0
libtpu: 0.0.40
codegen_flags: <defaults>
</compile_context>

<pallas_src>
import math
import functools

import jax
import jax.numpy as jnp
from jax import lax
from jax.experimental import pallas as pl
from jax.experimental.pallas import tpu as pltpu


def _mi_hist_kernel(xy_ref, hist_ref, *, num_bins, bin_lo_s, bin_step_s,
                    scale, chunk, n_chunks, unroll, window_dtype):
    """Accumulate the (num_bins, num_bins) joint KDE histogram for one pixel tile."""
    # zero this core's resident accumulator at its first pixel tile
    @pl.when(pl.program_id(1) == 0)
    def _():
        hist_ref[...] = jnp.zeros_like(hist_ref)

    # pre-scaled bin centers = linspace(vmin, vmax, num_bins) / (sqrt(2)*sigma),
    # generated in-kernel and broadcast to full chunk width ONCE (hoisted).
    bin_idx = lax.broadcasted_iota(jnp.int32, (num_bins, 1), 0).astype(jnp.float32)
    bins_b = jnp.broadcast_to(bin_lo_s + bin_idx * bin_step_s,
                              (num_bins, chunk))                 # (num_bins, chunk) f32

    def one_chunk(c, acc):
        start = pl.multiple_of(c * chunk, chunk)
        xy = xy_ref[:, pl.ds(start, chunk)]                      # (2, chunk) f32
        xs = xy[0:1, :] * scale                                  # (1, chunk) f32
        ys = xy[1:2, :] * scale
        # subtraction / square stay in f32; only the exp argument (magnitude
        # that matters is <~25) is cast, so exp + matmul run in window_dtype.
        dx = xs - bins_b
        dy = ys - bins_b
        win_x = jnp.exp((-(dx * dx)).astype(window_dtype))       # (num_bins, chunk)
        win_y = jnp.exp((-(dy * dy)).astype(window_dtype))
        # joint-histogram contribution: hist[i, j] += sum_p win_x[i,p]*win_y[j,p]
        # Kept as a loop-carried f32 accumulator (v7x MRB accumulates in place);
        # do NOT turn this into a per-chunk hist_ref[...] += ... RMW.
        # (A per-chunk XLU transpose of win_y from the A.B^T contraction is
        #  expected to be free filler while the EUP is the binding slot.)
        return acc + lax.dot_general(
            win_x, win_y, (((1,), (1,)), ((), ())),
            preferred_element_type=jnp.float32)

    def outer_body(o, acc):
        base = o * unroll
        for u in range(unroll):                                  # manual unroll
            acc = one_chunk(base + u, acc)
        return acc

    acc = lax.fori_loop(0, n_chunks // unroll, outer_body,
                        jnp.zeros((num_bins, num_bins), jnp.float32))
    hist_ref[...] += acc


def _tpu_defaults():
    """(n_cores, chunk, window_dtype) per TPU generation."""
    kind = ""
    try:
        dev = jax.devices()[0]
        if dev.platform == "tpu":
            kind = dev.device_kind.lower()
    except Exception:
        pass
    if "v7" in kind or "tpu7" in kind:
        return 2, 256, jnp.bfloat16      # 2 TensorCores, bf16 VPU/EUP/MXU
    if "v6" in kind:
        return 1, 256, jnp.bfloat16      # single TC, bf16 VPU/EUP/MXU
    if "v5" in kind:
        return 1, 128, jnp.float32       # no bf16 VPU/EUP; chunk=128 keeps f32 in-file
    return 1, 256, jnp.float32           # unknown generation: safe defaults


def mi_loss_gaussian(x, y, vmin=0.0, vmax=1.0, num_bins=64, gt_val=None,
                     window_dtype=None, n_cores=None, chunk=None,
                     tile_cap=32768):
    """Forward pass of MILossGaussian (sample_ratio=1.0).

    window_dtype / n_cores / chunk default per TPU generation (bf16 windows on
    v6e/v7x, f32 on v5e; megacore split only on v7x).
    """
    assert x.shape == y.shape
    assert x.shape[0] == 1 and x.shape[1] == 1, "reference torch.outer implies N == 1"
    # TODO(synk): sample_ratio < 1.0 path (torch.randperm subsampling) not implemented.

    auto_cores, auto_chunk, auto_dtype = _tpu_defaults()
    n_cores = auto_cores if n_cores is None else n_cores
    chunk = auto_chunk if chunk is None else chunk
    window_dtype = auto_dtype if window_dtype is None else window_dtype

    bin_width = (vmax - vmin) / num_bins
    sigma = bin_width * (1.0 / (2.0 * math.sqrt(2.0 * math.log(2.0))))
    scale = 1.0 / (math.sqrt(2.0) * sigma)                 # sqrt(1 / (2*sigma^2))
    norm_const = 1.0 / (math.sqrt(2.0 * math.pi) * sigma)
    bin_step = (vmax - vmin) / (num_bins - 1)              # torch.linspace spacing

    xf = x.reshape(1, -1).astype(jnp.float32)
    yf = y.reshape(1, -1).astype(jnp.float32)
    P = xf.shape[1]

    # Tiling: large pixel tiles (TP <= tile_cap, multiple of chunk) amortize the
    # ~0.35 us/grid-step overhead; inner chunk loop bounds vreg pressure.
    per_core = -(-P // n_cores)
    TP = max(chunk, min(tile_cap, -(-per_core // chunk) * chunk))
    n_chunks = TP // chunk
    unroll = 4 if n_chunks % 4 == 0 else (2 if n_chunks % 2 == 0 else 1)
    P_pad = -(-P // (n_cores * TP)) * (n_cores * TP)
    ntpc = P_pad // (n_cores * TP)                         # pixel tiles per core

    xy = jnp.concatenate([xf, yf], axis=0)                 # (2, P)
    if P_pad != P:
        # pad value sits 100*sigma beyond vmax (re-derived from the actual sigma)
        # -> scaled squared distance >= ~5000 -> exp underflows to exactly 0,
        # so padded pixels contribute nothing (also after the bf16 cast).
        pad_val = vmax + 100.0 * sigma
        xy = jnp.pad(xy, ((0, 0), (0, P_pad - P)), constant_values=pad_val)

    kernel = functools.partial(
        _mi_hist_kernel,
        num_bins=num_bins,
        bin_lo_s=vmin * scale,
        bin_step_s=bin_step * scale,
        scale=scale,
        chunk=chunk,
        n_chunks=n_chunks,
        unroll=unroll,
        window_dtype=window_dtype,
    )

    cost = pl.CostEstimate(
        flops=int(2 * num_bins * num_bins * P_pad),             # joint-hist matmul
        transcendentals=int(2 * num_bins * P_pad),              # win_x + win_y exps
        bytes_accessed=int(8 * P_pad + 4 * num_bins * num_bins * n_cores),
    )

    partial_hist = pl.pallas_call(
        kernel,
        out_shape=jax.ShapeDtypeStruct((n_cores, num_bins, num_bins), jnp.float32),
        grid_spec=pltpu.PrefetchScalarGridSpec(
            num_scalar_prefetch=0,
            grid=(n_cores, ntpc),
            in_specs=[
                pl.BlockSpec((2, TP), lambda c, k: (0, c * ntpc + k)),   # fused x/y tile
            ],
            out_specs=pl.BlockSpec((None, num_bins, num_bins),
                                   lambda c, k: (c, 0, 0)),              # per-core hist
        ),
        compiler_params=pltpu.CompilerParams(
            dimension_semantics=("parallel", "arbitrary")),
        cost_estimate=cost,
    )(xy)

    # ---- tiny (64x64) finalize in plain JAX (merge partial hists, normalise, KL) ----
    hist = partial_hist.sum(axis=0) * jnp.float32(norm_const ** 2)   # win/(sqrt(2pi)*sigma)
    hist_norm = jnp.sum(hist) + 1e-5                                 # per-batch norm (N == 1)
    p_joint = hist / hist_norm
    p_joint = p_joint / jnp.sum(p_joint)                             # global renorm (forward)
    p_x = jnp.sum(p_joint, axis=1)                                   # torch dim=2 marginal
    p_y = jnp.sum(p_joint, axis=0)                                   # torch dim=1 marginal
    px_py = jnp.outer(p_x, p_y)
    nzs = p_joint > 0.0
    safe_p = jnp.where(nzs, p_joint, 1.0)
    mi = jnp.sum(jnp.where(nzs, p_joint * jnp.log(safe_p / (px_py + 1e-12)), 0.0))

    if gt_val:
        return (mi - jnp.float32(gt_val)) ** 2
    return mi


if __name__ == "__main__":
    key = jax.random.PRNGKey(0)
    kx, ky = jax.random.split(key)
    # (N, 1, H, W) with values in [vmin, vmax] = [0, 1]
    x = jax.random.uniform(kx, (1, 1, 16, 16), dtype=jnp.float32)
    y = jax.random.uniform(ky, (1, 1, 16, 16), dtype=jnp.float32)

    loss = jax.jit(mi_loss_gaussian)(x, y)
    jax.block_until_ready(loss)
    print("KERNEL_OK")
</pallas_src>

<mosaic_0001>
module attributes {stable_mosaic.version = 11 : i64} {
  func.func @_mi_hist_kernel(%arg0: i32, %arg1: i32, %arg2: memref<2x256xf32, #tpu.memory_space<vmem>>, %arg3: memref<1x64x64xf32, #tpu.memory_space<vmem>>) attributes {dimension_semantics = [#tpu.dimension_semantics<parallel>, #tpu.dimension_semantics<arbitrary>], iteration_bounds = array<i64: 1, 1>, scalar_prefetch = 0 : i64, scratch_operands = 0 : i64, tpu.core_type = #tpu.core_type<tc>, window_params = [{transform_indices = @transform_0, window_bounds = array<i64: 2, 256>}, {transform_indices = @transform_1, window_bounds = array<i64: 1, 64, 64>}]} {
    %c0_i32 = arith.constant 0 : i32
    %0 = arith.cmpi eq, %arg1, %c0_i32 : i32
    %1 = arith.extui %0 : i1 to i32
    %c0_i32_0 = arith.constant 0 : i32
    %2 = arith.cmpi ne, %1, %c0_i32_0 : i32
    scf.if %2 {
      %cst_17 = arith.constant 0.000000e+00 : f32
      %44 = vector.broadcast %cst_17 : f32 to vector<64x64xf32>
      %c0_18 = arith.constant 0 : index
      %c0_19 = arith.constant 0 : index
      %c0_20 = arith.constant 0 : index
      %45 = vector.load %arg3[%c0_18, %c0_19, %c0_20] : memref<1x64x64xf32, #tpu.memory_space<vmem>>, vector<1x64x64xf32>
      %46 = vector.shape_cast %45 : vector<1x64x64xf32> to vector<64x64xf32>
      %47 = vector.shape_cast %44 : vector<64x64xf32> to vector<1x64x64xf32>
      tpu.vector_store %arg3[%c0_18, %c0_19, %c0_20], %47 {strides = array<i32>} : memref<1x64x64xf32, #tpu.memory_space<vmem>>, vector<1x64x64xf32>,
    } else {
    }
    %3 = tpu.iota {dimensions = array<i32: 0>} : vector<64x1xi32>
    %4 = arith.sitofp %3 : vector<64x1xi32> to vector<64x1xf32>
    %cst = arith.constant 1.69153953 : f32
    %5 = vector.broadcast %cst : f32 to vector<64x1xf32>
    %6 = arith.mulf %4, %5 : vector<64x1xf32>
    %cst_1 = arith.constant 0.000000e+00 : f32
    %7 = vector.broadcast %cst_1 : f32 to vector<64x1xf32>
    %8 = arith.addf %7, %6 : vector<64x1xf32>
    %9 = vector.shape_cast %8 : vector<64x1xf32> to vector<64x1xf32>
    %10 = vector.broadcast %9 : vector<64x1xf32> to vector<64x256xf32>
    %cst_2 = arith.constant 0.000000e+00 : f32
    %11 = vector.broadcast %cst_2 : f32 to vector<64x64xf32>
    %c0_i32_3 = arith.constant 0 : i32
    %c1_i32 = arith.constant 1 : i32
    %12 = arith.muli %c0_i32_3, %c1_i32 : i32
    %c0_i32_4 = arith.constant 0 : i32
    %13 = arith.addi %12, %c0_i32_4 : i32
    %c256_i32 = arith.constant 256 : i32
    %14 = arith.muli %13, %c256_i32 : i32
    %15 = tpu.assume_multiple %14, 256 : i32
    %c0 = arith.constant 0 : index
    %16 = arith.index_cast %15 : i32 to index
    %17 = vector.load %arg2[%c0, %16] : memref<2x256xf32, #tpu.memory_space<vmem>>, vector<2x256xf32>
    %18 = vector.extract_strided_slice %17 {offsets = [0, 0], sizes = [1, 256], strides = [1, 1]} : vector<2x256xf32> to vector<1x256xf32>
    %cst_5 = arith.constant 106.566994 : f32
    %19 = vector.broadcast %cst_5 : f32 to vector<1x256xf32>
    %20 = arith.mulf %18, %19 : vector<1x256xf32>
    %21 = vector.extract_strided_slice %17 {offsets = [1, 0], sizes = [1, 256], strides = [1, 1]} : vector<2x256xf32> to vector<1x256xf32>
    %cst_6 = arith.constant 106.566994 : f32
    %22 = vector.broadcast %cst_6 : f32 to vector<1x256xf32>
    %23 = arith.mulf %21, %22 : vector<1x256xf32>
    %24 = vector.broadcast %20 : vector<1x256xf32> to vector<64x256xf32>
    %25 = arith.subf %24, %10 : vector<64x256xf32>
    %26 = vector.broadcast %23 : vector<1x256xf32> to vector<64x256xf32>
    %27 = arith.subf %26, %10 : vector<64x256xf32>
    %28 = arith.mulf %25, %25 : vector<64x256xf32>
    %cst_7 = arith.constant 0.000000e+00 : f32
    %29 = vector.broadcast %cst_7 : f32 to vector<64x256xf32>
    %30 = arith.subf %29, %28 : vector<64x256xf32>
    %31 = math.exp %30 : vector<64x256xf32>
    %32 = arith.mulf %27, %27 : vector<64x256xf32>
    %cst_8 = arith.constant 0.000000e+00 : f32
    %33 = vector.broadcast %cst_8 : f32 to vector<64x256xf32>
    %34 = arith.subf %33, %32 : vector<64x256xf32>
    %35 = math.exp %34 : vector<64x256xf32>
    %cst_9 = arith.constant dense<0.000000e+00> : vector<64x64xf32>
    %36 = tpu.matmul %31, %35, %cst_9 {dimension_numbers = #tpu.dot_dimension_numbers<[1], [1], [0], [0], [0, 0, 1, 0], [], []>} : vector<64x256xf32>, vector<64x256xf32>, vector<64x64xf32> -> vector<64x64xf32>
    %37 = arith.addf %11, %36 : vector<64x64xf32>
    %c1_i32_10 = arith.constant 1 : i32
    %c0_11 = arith.constant 0 : index
    %c0_12 = arith.constant 0 : index
    %c0_13 = arith.constant 0 : index
    %38 = vector.load %arg3[%c0_11, %c0_12, %c0_13] : memref<1x64x64xf32, #tpu.memory_space<vmem>>, vector<1x64x64xf32>
    %39 = vector.shape_cast %38 : vector<1x64x64xf32> to vector<64x64xf32>
    %40 = arith.addf %39, %37 : vector<64x64xf32>
    %c0_14 = arith.constant 0 : index
    %c0_15 = arith.constant 0 : index
    %c0_16 = arith.constant 0 : index
    %41 = vector.load %arg3[%c0_14, %c0_15, %c0_16] : memref<1x64x64xf32, #tpu.memory_space<vmem>>, vector<1x64x64xf32>
    %42 = vector.shape_cast %41 : vector<1x64x64xf32> to vector<64x64xf32>
    %43 = vector.shape_cast %40 : vector<64x64xf32> to vector<1x64x64xf32>
    tpu.vector_store %arg3[%c0_14, %c0_15, %c0_16], %43 {strides = array<i32>} : memref<1x64x64xf32, #tpu.memory_space<vmem>>, vector<1x64x64xf32>,
    return
  }
  func.func @transform_0(%arg0: i32, %arg1: i32) -> (i32, i32) {
    %c1_i32 = arith.constant 1 : i32
    %0 = arith.muli %arg0, %c1_i32 : i32
    %1 = arith.addi %0, %arg1 : i32
    %c0_i32 = arith.constant 0 : i32
    %c0_i32_0 = arith.constant 0 : i32
    return %c0_i32, %1 : i32, i32
  }
  func.func @transform_1(%arg0: i32, %arg1: i32) -> (i32, i32, i32) {
    %c0_i32 = arith.constant 0 : i32
    %c0_i32_0 = arith.constant 0 : i32
    %c0_i32_1 = arith.constant 0 : i32
    return %arg0, %c0_i32, %c0_i32_0 : i32, i32, i32
  }
}

</mosaic_0001>

<bundles_post_ra>
// kernel: mi_loss_gaussian.1
= control target key start
LH: loop header
LB: loop body
LE: loop exit
PB: predicated region body
PF: predicated region fallthrough
CT: control target
= control target key end

     0   :  { %v43_v0 = vlaneseq  ;;  %vm34_vm0 = vcmask 523264   ;;  %s649_s0 = inlined_call_operand.vmem [shape: f32[2,256], index: 0, kind: input, shape index: {}]   ;;  %s650_s1 = inlined_call_operand.vmem [shape: f32[1,64,64], index: 1, kind: output, shape index: {}]  }
   0x1   :  { %v76_v1 = vld [vmem:[%s649_s0] sm:$0xf] }
   0x2   :  { %v463_v2 = vshrl.u32 %v43_v0, 7  ;;  %v465_v3 = vmul.f32 106.56699, %v76_v1 }
   0x4   :  { %v51_v4 = vadd.s32 56, %v463_v2  ;;  %v101_v5 = vperm.slane %v465_v3, 1  ;;  %v102_v6 = vperm.slane %v465_v3, 3  ;;  %v50_v7 = vadd.s32 48, %v463_v2 }
   0x5   :  { %v49_v8 = vadd.s32 40, %v463_v2  ;;  %v48_v9 = vadd.s32 32, %v463_v2  ;;  %v47_v10 = vadd.s32 24, %v463_v2  ;;  %v46_v20 = vadd.s32 16, %v463_v2 }
   0x6   :  { %v59_v11 = vcvt.s32.f32 %v51_v4  ;;  %v474_v12 = vperm.slane %v101_v5, 1  ;;  %v476_v13 = vperm.slane %v102_v6, 1  ;;  %v58_v14 = vcvt.s32.f32 %v50_v7 }
   0x7   :  { %v57_v15 = vcvt.s32.f32 %v49_v8  ;;  %v56_v16 = vcvt.s32.f32 %v48_v9  ;;  %v55_v17 = vcvt.s32.f32 %v47_v10  ;;  %v54_v45 = vcvt.s32.f32 %v46_v20 }
   0x8   :  { %v478_v18 = vmul.f32 1.6915395, %v59_v11  ;;  %v480_v19 = vmul.f32 1.6915395, %v58_v14  ;;  %v45_v46 = vadd.s32 8, %v463_v2  ;;  %v52_v56 = vcvt.s32.f32 %v463_v2 }
   0x9   :  { %v483_v21 = vmul.f32 1.6915395, %v57_v15  ;;  %v485_v22 = vmul.f32 1.6915395, %v56_v16  ;;  %v487_v23 = vmul.f32 1.6915395, %v55_v17 }
   0xa   :  { %v121_v24 = vsub.f32 %v474_v12, %v478_v18  ;;  %v122_v25 = vsub.f32 %v476_v13, %v478_v18  ;;  %v119_v26 = vsub.f32 %v474_v12, %v480_v19  ;;  %v120_v27 = vsub.f32 %v476_v13, %v480_v19 }
   0xb   :  { %v117_v28 = vsub.f32 %v474_v12, %v483_v21  ;;  %v118_v29 = vsub.f32 %v476_v13, %v483_v21  ;;  %v115_v30 = vsub.f32 %v474_v12, %v485_v22  ;;  %v116_v31 = vsub.f32 %v476_v13, %v485_v22 }
   0xc   :  { %v201_v32 = vmul.f32 %v121_v24, %v121_v24  ;;  %v202_v33 = vmul.f32 %v122_v25, %v122_v25  ;;  %v199_v34 = vmul.f32 %v119_v26, %v119_v26  ;;  %v200_v35 = vmul.f32 %v120_v27, %v120_v27 }
   0xd   :  { %v197_v36 = vmul.f32 %v117_v28, %v117_v28  ;;  %v198_v37 = vmul.f32 %v118_v29, %v118_v29  ;;  %v195_v38 = vmul.f32 %v115_v30, %v115_v30  ;;  %v196_v44 = vmul.f32 %v116_v31, %v116_v31 }
   0xe   :  { %v217_v39 = vsub.f32 0.0, %v201_v32  ;;  %v218_v40 = vsub.f32 0.0, %v202_v33  ;;  %v215_v41 = vsub.f32 0.0, %v199_v34  ;;  %v216_v42 = vsub.f32 0.0, %v200_v35 }
   0xf   :  { %v213_v43 = vsub.f32 0.0, %v197_v36  ;;  %v113_v50 = vsub.f32 %v474_v12, %v487_v23  ;;  %v214_v52 = vsub.f32 0.0, %v198_v37  ;;  %v114_v53 = vsub.f32 %v476_v13, %v487_v23 }
  0x10   :  { %v247_v47 = vmul.f32 1.442695, %v217_v39  ;;  %v249_v48 = vmul.f32 1.442695, %v218_v40  ;;  %v243_v49 = vmul.f32 1.442695, %v215_v41  ;;  %v53_v59 = vcvt.s32.f32 %v45_v46 }
  0x11   :  { %v245_v51 = vmul.f32 1.442695, %v216_v42  ;;  %v211_v54 = vsub.f32 0.0, %v195_v38  ;;  %v193_v55 = vmul.f32 %v113_v50, %v113_v50  ;;  %v194_v57 = vmul.f32 %v114_v53, %v114_v53 }
  0x12   :  { %385 = vpow2.f32 %v247_v47  ;;  %v511_v58 = vmul.f32 1.6915395, %v54_v45  ;;  %v239_v60 = vmul.f32 1.442695, %v213_v43  ;;  %v212_v61 = vsub.f32 0.0, %v196_v44 }
  0x13   :  { %387 = vpow2.f32 %v249_v48  ;;  %v241_v62 = vmul.f32 1.442695, %v214_v52  ;;  %v209_v1 = vsub.f32 0.0, %v193_v55  ;;  %v517_v4 = vmul.f32 1.6915395, %v53_v59 }
  0x14   :  { %389 = vpow2.f32 %v243_v49  ;;  %v111_v63 = vsub.f32 %v474_v12, %v511_v58  ;;  %v112_v0 = vsub.f32 %v476_v13, %v511_v58  ;;  %v235_v2 = vmul.f32 1.442695, %v211_v54 }
  0x15   :  { %391 = vpow2.f32 %v245_v51  ;;  %v210_v5 = vsub.f32 0.0, %v194_v57  ;;  %v60_v7 = vmul.f32 1.6915395, %v52_v56  ;;  %v109_v10 = vsub.f32 %v474_v12, %v517_v4 }
  0x16   :  { %v191_v6 = vmul.f32 %v111_v63, %v111_v63  ;;  %393 = vpow2.f32 %v239_v60  ;;  %v192_v9 = vmul.f32 %v112_v0, %v112_v0  ;;  %v79_v11 = vperm.slane %v465_v3, 0 }
  0x17   :  { %395 = vpow2.f32 %v241_v62  ;;  %v237_v15 = vmul.f32 1.442695, %v212_v61  ;;  %v110_v16 = vsub.f32 %v476_v13, %v517_v4  ;;  %v231_v20 = vmul.f32 1.442695, %v209_v1 }
  0x18   :  { %v386_v8 = vpop.eup %385  ;;  %397 = vpow2.f32 %v235_v2  ;;  %v233_v25 = vmul.f32 1.442695, %v210_v5  ;;  %v207_v26 = vsub.f32 0.0, %v191_v6  ;;  %v107_v27 = vsub.f32 %v474_v12, %v60_v7 }
  0x19   :  { %v388_v14 = vpop.eup %387  ;;  %368 = vmatpush.xpose.msra.mxu2 %v386_v8  ;;  %259 = vmatpush.xpose.msra.mxu0 %v386_v8  ;;  %v208_v28 = vsub.f32 0.0, %v192_v9  ;;  %v189_v29 = vmul.f32 %v109_v10, %v109_v10  ;;  %v108_v30 = vsub.f32 %v476_v13, %v60_v7  ;;  %v526_v31 = vperm.slane %v79_v11, 0 }
  0x1a   :  { %v390_v17 = vpop.eup %389  ;;  %376 = vmatpush.xpose.msra.mxu3 %v388_v14  ;;  %300 = vmatpush.xpose.msra.mxu1 %v388_v14  ;;  %399 = vpow2.f32 %v237_v15  ;;  %v190_v32 = vmul.f32 %v110_v16, %v110_v16  ;;  %v80_v33 = vperm.slane %v465_v3, 2  ;;  %v187_v36 = vmul.f32 %v107_v27, %v107_v27 }
  0x1b   :  { %v392_v24 = vpop.eup %391  ;;  %401 = vpow2.f32 %v231_v20  ;;  %v93_v35 = vsub.f32 %v526_v31, %v485_v22  ;;  %v85_v13 = vsub.f32 %v526_v31, %v60_v7  ;;  %v227_v38 = vmul.f32 1.442695, %v207_v26 }
  0x1c   :  { %v394_v34 = vpop.eup %393  ;;  %403 = vpow2.f32 %v233_v25  ;;  %v531_v37 = vperm.slane %v80_v33, 0  ;;  %v229_v39 = vmul.f32 1.442695, %v208_v28  ;;  %v205_v40 = vsub.f32 0.0, %v189_v29 }
  0x1d   :  { %369 = vmatpush.xpose.msra.mxu2 %v390_v17  ;;  %260 = vmatpush.xpose.msra.mxu0 %v390_v17  ;;  %v396_v12 = vpop.eup %395  ;;  %v188_v41 = vmul.f32 %v108_v30, %v108_v30  ;;  %v206_v3 = vsub.f32 0.0, %v190_v32  ;;  %v131_v43 = vmul.f32 %v93_v35, %v93_v35  ;;  %v123_v46 = vmul.f32 %v85_v13, %v85_v13 }
  0x1e   :  { %377 = vmatpush.xpose.msra.mxu3 %v392_v24  ;;  %301 = vmatpush.xpose.msra.mxu1 %v392_v24  ;;  %v398_v42 = vpop.eup %397  ;;  %v94_v44 = vsub.f32 %v531_v37, %v485_v22  ;;  %v86_v45 = vsub.f32 %v531_v37, %v60_v7  ;;  %v203_v48 = vsub.f32 0.0, %v187_v36  ;;  %405 = vpow2.f32 %v227_v38 }
  0x1f   :  { %v223_v51 = vmul.f32 1.442695, %v205_v40  ;;  %v204_v52 = vsub.f32 0.0, %v188_v41  ;;  %407 = vpow2.f32 %v229_v39  ;;  %v225_v55 = vmul.f32 1.442695, %v206_v3 }
  0x20   :  { %v400_v47 = vpop.eup %399  ;;  %v132_v49 = vmul.f32 %v94_v44, %v94_v44  ;;  %v124_v53 = vmul.f32 %v86_v45, %v86_v45  ;;  %v147_v56 = vsub.f32 0.0, %v131_v43  ;;  %v95_v22 = vsub.f32 %v526_v31, %v483_v21 }
  0x21   :  { %370 = vmatpush.xpose.msra.mxu2 %v394_v34  ;;  %261 = vmatpush.xpose.msra.mxu0 %v394_v34  ;;  %v402_v50 = vpop.eup %401  ;;  %v139_v57 = vsub.f32 0.0, %v123_v46  ;;  %v96_v59 = vsub.f32 %v531_v37, %v483_v21  ;;  %v219_v60 = vmul.f32 1.442695, %v203_v48  ;;  %v87_v62 = vsub.f32 %v526_v31, %v517_v4 }
  0x22   :  { %378 = vmatpush.xpose.msra.mxu3 %v396_v12  ;;  %302 = vmatpush.xpose.msra.mxu1 %v396_v12  ;;  %v404_v54 = vpop.eup %403  ;;  %v148_v61 = vsub.f32 0.0, %v132_v49  ;;  %409 = vpow2.f32 %v223_v51  ;;  %v221_v63 = vmul.f32 1.442695, %v204_v52  ;;  %v140_v0 = vsub.f32 0.0, %v124_v53 }
  0x23   :  { %v88_v1 = vsub.f32 %v531_v37, %v517_v4  ;;  %411 = vpow2.f32 %v225_v55  ;;  %v171_v2 = vmul.f32 1.442695, %v147_v56  ;;  %v133_v5 = vmul.f32 %v95_v22, %v95_v22 }
  0x24   :  { %v406_v6 = vpop.eup %405  ;;  %v155_v21 = vmul.f32 1.442695, %v139_v57  ;;  %v134_v7 = vmul.f32 %v96_v59, %v96_v59  ;;  %413 = vpow2.f32 %v219_v60  ;;  %v173_v9 = vmul.f32 1.442695, %v148_v61 }
  0x25   :  { %371 = vmatpush.xpose.msra.mxu2 %v398_v42  ;;  %262 = vmatpush.xpose.msra.mxu0 %v398_v42  ;;  %v408_v8 = vpop.eup %407  ;;  %v125_v10 = vmul.f32 %v87_v62, %v87_v62  ;;  %415 = vpow2.f32 %v221_v63  ;;  %v157_v11 = vmul.f32 1.442695, %v140_v0  ;;  %v126_v14 = vmul.f32 %v88_v1, %v88_v1 }
  0x26   :  { %379 = vmatpush.xpose.msra.mxu3 %v400_v47  ;;  %303 = vmatpush.xpose.msra.mxu1 %v400_v47  ;;  %417 = vpow2.f32 %v171_v2  ;;  %v149_v4 = vsub.f32 0.0, %v133_v5  ;;  %v97_v15 = vsub.f32 %v526_v31, %v480_v19  ;;  %v150_v17 = vsub.f32 0.0, %v134_v7 }
  0x27   :  { %419 = vpow2.f32 %v155_v21  ;;  %v98_v20 = vsub.f32 %v531_v37, %v480_v19  ;;  %v141_v25 = vsub.f32 0.0, %v125_v10  ;;  %v89_v26 = vsub.f32 %v526_v31, %v511_v58 }
  0x28   :  { %v410_v16 = vpop.eup %409  ;;  %421 = vpow2.f32 %v173_v9  ;;  %v142_v27 = vsub.f32 0.0, %v126_v14  ;;  %v90_v28 = vsub.f32 %v531_v37, %v511_v58  ;;  %v175_v30 = vmul.f32 1.442695, %v149_v4 }
  0x29   :  { %372 = vmatpush.xpose.msra.mxu2 %v402_v50  ;;  %263 = vmatpush.xpose.msra.mxu0 %v402_v50  ;;  %v412_v24 = vpop.eup %411  ;;  %423 = vpow2.f32 %v157_v11  ;;  %v135_v32 = vmul.f32 %v97_v15, %v97_v15  ;;  %v177_v19 = vmul.f32 1.442695, %v150_v17  ;;  %v136_v34 = vmul.f32 %v98_v20, %v98_v20 }
  0x2a   :  { %380 = vmatpush.xpose.msra.mxu3 %v404_v54  ;;  %304 = vmatpush.xpose.msra.mxu1 %v404_v54  ;;  %v414_v29 = vpop.eup %413  ;;  %v159_v12 = vmul.f32 1.442695, %v141_v25  ;;  %v127_v36 = vmul.f32 %v89_v26, %v89_v26  ;;  %v161_v38 = vmul.f32 1.442695, %v142_v27  ;;  %v128_v39 = vmul.f32 %v90_v28, %v90_v28 }
  0x2b   :  { %v416_v33 = vpop.eup %415  ;;  %425 = vpow2.f32 %v175_v30  ;;  %v151_v58 = vsub.f32 0.0, %v135_v32  ;;  %v99_v41 = vsub.f32 %v526_v31, %v478_v18  ;;  %v152_v3 = vsub.f32 0.0, %v136_v34 }
  0x2c   :  { %v418_v35 = vpop.eup %417  ;;  %427 = vpow2.f32 %v177_v19  ;;  %v100_v43 = vsub.f32 %v531_v37, %v478_v18  ;;  %v143_v44 = vsub.f32 0.0, %v127_v36  ;;  %v91_v45 = vsub.f32 %v526_v31, %v487_v23 }
  0x2d   :  { %373 = vmatpush.xpose.msra.mxu2 %v406_v6  ;;  %264 = vmatpush.xpose.msra.mxu0 %v406_v6  ;;  %v420_v13 = vpop.eup %419  ;;  %429 = vpow2.f32 %v159_v12  ;;  %v144_v46 = vsub.f32 0.0, %v128_v39  ;;  %v92_v47 = vsub.f32 %v531_v37, %v487_v23  ;;  %v179_v48 = vmul.f32 1.442695, %v151_v58 }
  0x2e   :  { %381 = vmatpush.xpose.msra.mxu3 %v408_v8  ;;  %305 = vmatpush.xpose.msra.mxu1 %v408_v8  ;;  %v422_v40 = vpop.eup %421  ;;  %431 = vpow2.f32 %v161_v38  ;;  %v137_v49 = vmul.f32 %v99_v41, %v99_v41  ;;  %v181_v50 = vmul.f32 1.442695, %v152_v3  ;;  %v138_v51 = vmul.f32 %v100_v43, %v100_v43 }
  0x2f   :  { %v424_v42 = vpop.eup %423  ;;  %v163_v18 = vmul.f32 1.442695, %v143_v44  ;;  %v129_v53 = vmul.f32 %v91_v45, %v91_v45  ;;  %v165_v55 = vmul.f32 1.442695, %v144_v46  ;;  %v130_v56 = vmul.f32 %v92_v47, %v92_v47 }
  0x30   :  { %433 = vpow2.f32 %v179_v48  ;;  %v153_v22 = vsub.f32 0.0, %v137_v49  ;;  %v154_v59 = vsub.f32 0.0, %v138_v51  ;;  %v449_v9 = vmov 0.0  }
  0x31   :  { %374 = vmatpush.xpose.msra.mxu2 %v410_v16  ;;  %265 = vmatpush.xpose.msra.mxu0 %v410_v16  ;;  %v426_v52 = vpop.eup %425  ;;  %435 = vpow2.f32 %v181_v50  ;;  %v145_v23 = vsub.f32 0.0, %v129_v53  ;;  %v146_v37 = vsub.f32 0.0, %v130_v56  ;;  %35 = vst.msk [vmem:[%s650_s1] sm:$0xff] %vm34_vm0, %v449_v9 }
  0x32   :  { %382 = vmatpush.xpose.msra.mxu3 %v412_v24  ;;  %306 = vmatpush.xpose.msra.mxu1 %v412_v24  ;;  %v428_v54 = vpop.eup %427  ;;  %437 = vpow2.f32 %v163_v18  ;;  %v183_v60 = vmul.f32 1.442695, %v153_v22  ;;  %v185_v61 = vmul.f32 1.442695, %v154_v59  ;;  %36 = vst.msk [vmem:[%s650_s1 + $0x8] sm:$0xff] %vm34_vm0, %v449_v9 }
  0x33   :  { %v430_v31 = vpop.eup %429  ;;  %439 = vpow2.f32 %v165_v55  ;;  %v167_v63 = vmul.f32 1.442695, %v145_v23  ;;  %v169_v1 = vmul.f32 1.442695, %v146_v37  ;;  %37 = vst.msk [vmem:[%s650_s1 + $0x10] sm:$0xff] %vm34_vm0, %v449_v9 }
  0x34   :  { %v432_v57 = vpop.eup %431  ;;  %441 = vpow2.f32 %v183_v60  ;;  %38 = vst.msk [vmem:[%s650_s1 + $0x18] sm:$0xff] %vm34_vm0, %v449_v9 }
  0x35   :  { %375 = vmatpush.xpose.msra.mxu2 %v414_v29  ;;  %266 = vmatpush.xpose.msra.mxu0 %v414_v29  ;;  %443 = vpow2.f32 %v185_v61  ;;  %39 = vst.msk [vmem:[%s650_s1 + $0x20] sm:$0xff] %vm34_vm0, %v449_v9 }
  0x36   :  { %383 = vmatpush.xpose.msra.mxu3 %v416_v33  ;;  %307 = vmatpush.xpose.msra.mxu1 %v416_v33  ;;  %v434_v62 = vpop.eup %433  ;;  %445 = vpow2.f32 %v167_v63  ;;  %40 = vst.msk [vmem:[%s650_s1 + $0x28] sm:$0xff] %vm34_vm0, %v449_v9 }
  0x37   :  { %v436_v0 = vpop.eup %435  ;;  %447 = vpow2.f32 %v169_v1  ;;  %41 = vst.msk [vmem:[%s650_s1 + $0x30] sm:$0xff] %vm34_vm0, %v449_v9 }
  0x38   :  { %279 = vmatmul.f32.vlgmr.msra.gmra.mxu2 %v418_v35  ;;  %267 = vmatmul.f32.vlgmr.msra.gmra.mxu0 %v420_v13  ;;  %v438_v2 = vpop.eup %437  ;;  %42 = vst.msk [vmem:[%s650_s1 + $0x38] sm:$0xff] %vm34_vm0, %v449_v9  ;;  %v333_v14 = vld [vmem:[%s650_s1] sm:$0xff] }
  0x39   :  { %320 = vmatmul.f32.vlgmr.msra.gmra.mxu3 %v422_v40  ;;  %308 = vmatmul.f32.vlgmr.msra.gmra.mxu1 %v424_v42  ;;  %v440_v5 = vpop.eup %439  ;;  %v334_v27 = vld [vmem:[%s650_s1 + $0x8] sm:$0xff] }
  0x3a   :  { %v442_v6 = vpop.eup %441  ;;  %v335_v36 = vld [vmem:[%s650_s1 + $0x10] sm:$0xff] }
  0x3b   :  { %v444_v21 = vpop.eup %443  ;;  %v336_v44 = vld [vmem:[%s650_s1 + $0x18] sm:$0xff] }
  0x3c   :  { %v446_v7 = vpop.eup %445  ;;  %v337_v20 = vld [vmem:[%s650_s1 + $0x20] sm:$0xff] }
  0x3d   :  { %v448_v8 = vpop.eup %447  ;;  %v338_v19 = vld [vmem:[%s650_s1 + $0x28] sm:$0xff] }
  0x3e   :  { %v339_v41 = vld [vmem:[%s650_s1 + $0x30] sm:$0xff] }
  0x3f   :  { %v340_v50 = vld [vmem:[%s650_s1 + $0x38] sm:$0xff] }
  0x40   :  { %282 = vmatmul.f32.gmra.mxu2 %v426_v52  ;;  %270 = vmatmul.f32.gmra.mxu0 %v430_v31 }
  0x41   :  { %323 = vmatmul.f32.gmra.mxu3 %v428_v54  ;;  %311 = vmatmul.f32.gmra.mxu1 %v432_v57 }
  0x48   :  { %285 = vmatmul.f32.gmra.mxu2 %v434_v62  ;;  %273 = vmatmul.f32.gmra.mxu0 %v438_v2 }
  0x49   :  { %326 = vmatmul.f32.gmra.mxu3 %v436_v0  ;;  %314 = vmatmul.f32.gmra.mxu1 %v440_v5 }
  0x50   :  { %288 = vmatmul.f32.gmra.mxu2 %v442_v6  ;;  %276 = vmatmul.f32.gmra.mxu0 %v446_v7 }
  0x51   :  { %329 = vmatmul.f32.gmra.mxu3 %v444_v21  ;;  %317 = vmatmul.f32.gmra.mxu1 %v448_v8 }
  0xb5   :  { %v268_v10 = vpop.f32.mrf.mxu0 }
  0xb6   :  { %v309_v11 = vpop.f32.mrf.mxu1 }
  0xb7   :  { %v310_v4 = vadd.f32 %v309_v11, %v268_v10 }
  0xb9   :  { %v341_v15 = vadd.f32 %v333_v14, %v310_v4 }
  0xbb   :  { %v280_v16 = vpop.f32.mrf.mxu2  ;;  %350 = vst.msk [vmem:[%s650_s1] sm:$0xff] %vm34_vm0, %v341_v15 }
  0xbc   :  { %v321_v17 = vpop.f32.mrf.mxu3 }
  0xbd   :  { %v322_v24 = vadd.f32 %v321_v17, %v280_v16  ;;  %v271_v25 = vpop.f32.mrf.mxu0 }
  0xbe   :  { %v312_v26 = vpop.f32.mrf.mxu1 }
  0xbf   :  { %v345_v28 = vadd.f32 %v337_v20, %v322_v24  ;;  %v313_v29 = vadd.f32 %v312_v26, %v271_v25 }
  0xc1   :  { %354 = vst.msk [vmem:[%s650_s1 + $0x20] sm:$0xff] %vm34_vm0, %v345_v28  ;;  %v342_v30 = vadd.f32 %v334_v27, %v313_v29 }
  0xc3   :  { %v283_v32 = vpop.f32.mrf.mxu2  ;;  %351 = vst.msk [vmem:[%s650_s1 + $0x8] sm:$0xff] %vm34_vm0, %v342_v30 }
  0xc4   :  { %v324_v33 = vpop.f32.mrf.mxu3 }
  0xc5   :  { %v325_v34 = vadd.f32 %v324_v33, %v283_v32  ;;  %v274_v35 = vpop.f32.mrf.mxu0 }
  0xc6   :  { %v315_v12 = vpop.f32.mrf.mxu1 }
  0xc7   :  { %v346_v13 = vadd.f32 %v338_v19, %v325_v34  ;;  %v316_v38 = vadd.f32 %v315_v12, %v274_v35 }
  0xc9   :  { %355 = vst.msk [vmem:[%s650_s1 + $0x28] sm:$0xff] %vm34_vm0, %v346_v13  ;;  %v343_v39 = vadd.f32 %v335_v36, %v316_v38 }
  0xcb   :  { %v286_v40 = vpop.f32.mrf.mxu2  ;;  %352 = vst.msk [vmem:[%s650_s1 + $0x10] sm:$0xff] %vm34_vm0, %v343_v39 }
  0xcc   :  { %v327_v58 = vpop.f32.mrf.mxu3 }
  0xcd   :  { %v328_v42 = vadd.f32 %v327_v58, %v286_v40  ;;  %v277_v3 = vpop.f32.mrf.mxu0 }
  0xce   :  { %v318_v43 = vpop.f32.mrf.mxu1 }
  0xcf   :  { %v347_v45 = vadd.f32 %v339_v41, %v328_v42  ;;  %v319_v46 = vadd.f32 %v318_v43, %v277_v3 }
  0xd1   :  { %356 = vst.msk [vmem:[%s650_s1 + $0x30] sm:$0xff] %vm34_vm0, %v347_v45  ;;  %v344_v47 = vadd.f32 %v336_v44, %v319_v46 }
  0xd3   :  { %v289_v48 = vpop.f32.mrf.mxu2  ;;  %353 = vst.msk [vmem:[%s650_s1 + $0x18] sm:$0xff] %vm34_vm0, %v344_v47 }
  0xd4   :  { %v330_v49 = vpop.f32.mrf.mxu3 }
  0xd5   :  { %v331_v51 = vadd.f32 %v330_v49, %v289_v48 }
  0xd7   :  { %v348_v52 = vadd.f32 %v340_v50, %v331_v51 }
  0xd9   :  { %357 = vst.msk [vmem:[%s650_s1 + $0x38] sm:$0xff] %vm34_vm0, %v348_v52 }

</bundles_post_ra>
